<compile_context>
chip_gen: v6e
topology: v6e:2x2x1
jax: 0.10.0
libtpu: 0.0.40
codegen_flags: <defaults>
</compile_context>

<pallas_src>
import jax
import jax.numpy as jnp
from jax.experimental import pallas as pl
from jax.experimental.pallas import tpu as pltpu

# ---------------- model dimensions (small, synthetic) ----------------
NUM_LEGS = 3     # len(self.legs)
B = 8            # batch
D_IN = 32        # per-sample input features
H = 128          # trunc_input_size (leg output size)
H2 = 128         # trunk hidden
N_OUT = 32       # trunk output
N_PAD = 128      # lane-padded output width (kernel-internal)


# ---------------- Pallas kernel ----------------
def _mt_leg_kernel(tids_ref,     # (B, 1)  int32 task ids
                   x_ref,        # (B, D_IN)
                   wleg_ref,     # (NUM_LEGS, D_IN, H)   all leg weights, VMEM-resident
                   bleg_ref,     # (NUM_LEGS, 1, H)
                   w1_ref,       # (H, H2)
                   b1_ref,       # (1, H2)
                   w2_ref,       # (H2, N_PAD)  lane-padded trunk output layer
                   b2_ref,       # (1, N_PAD)
                   out_ref):     # (B, N_PAD)
    x = x_ref[...]               # (B, D_IN)
    tids = tids_ref[...]         # (B, 1) int32

    # Per-task leg dispatch: NUM_LEGS batched matmuls + mask select.
    # (Out-of-range task ids simply leave zeros -- no OOB access possible.)
    feats = jnp.zeros((x.shape[0], H), jnp.float32)
    for leg in range(NUM_LEGS):
        leg_out = (jnp.dot(x, wleg_ref[leg], preferred_element_type=jnp.float32)
                   + bleg_ref[leg])                       # (B, H)
        feats = jnp.where(tids == leg, leg_out, feats)

    # trunk: ReLU(feats @ W1 + b1) @ W2 + b2
    h = jnp.dot(feats, w1_ref[...], preferred_element_type=jnp.float32) + b1_ref[...]
    h = jnp.maximum(h, 0.0)
    out = jnp.dot(h, w2_ref[...], preferred_element_type=jnp.float32) + b2_ref[...]

    out_ref[...] = out.astype(out_ref.dtype)              # lane-dense (B, 128) store


# ---------------- wrapper ----------------
@jax.jit
def mt_leg_model_forward(x, task_ids, params):
    """x: [B, D_IN] f32, task_ids: [B] int (or None -> all samples use last leg)."""
    w_leg, b_leg, w1, b1, w2, b2 = params
    batch = x.shape[0]
    if task_ids is None:
        # matches: task_ids = ones(batch) * (len(self.legs) - 1)
        task_ids = jnp.full((batch,), NUM_LEGS - 1, dtype=jnp.int32)
    tids2 = task_ids.astype(jnp.int32).reshape(batch, 1)

    # Lane-pad the final layer so the kernel's output store is a full 128-lane
    # unmasked vst; slice back to N_OUT outside the kernel.
    w2_p = jnp.zeros((H2, N_PAD), jnp.float32).at[:, :N_OUT].set(w2)
    b2_p = jnp.zeros((1, N_PAD), jnp.float32).at[:, :N_OUT].set(b2)

    vmem = pl.BlockSpec(memory_space=pltpu.MemorySpace.VMEM)  # whole array in VMEM
    out_padded = pl.pallas_call(
        _mt_leg_kernel,
        out_shape=jax.ShapeDtypeStruct((batch, N_PAD), jnp.float32),
        in_specs=[vmem] * 8,
        out_specs=vmem,
    )(tids2, x, w_leg, b_leg, w1, b1, w2_p, b2_p)

    return out_padded[:, :N_OUT]


# ---------------- deterministic parameter init ----------------
def init_params(key):
    ks = jax.random.split(key, 6)
    w_leg = jax.random.normal(ks[0], (NUM_LEGS, D_IN, H), jnp.float32) * 0.05
    b_leg = jax.random.normal(ks[1], (NUM_LEGS, 1, H), jnp.float32) * 0.01
    w1 = jax.random.normal(ks[2], (H, H2), jnp.float32) * 0.05
    b1 = jax.random.normal(ks[3], (1, H2), jnp.float32) * 0.01
    w2 = jax.random.normal(ks[4], (H2, N_OUT), jnp.float32) * 0.05
    b2 = jax.random.normal(ks[5], (1, N_OUT), jnp.float32) * 0.01
    return (w_leg, b_leg, w1, b1, w2, b2)


# ---------------- pure-JAX reference (mirrors the PyTorch forward) ----------------
def ref_forward(x, task_ids, params):
    w_leg, b_leg, w1, b1, w2, b2 = params
    if task_ids is None:
        task_ids = jnp.full((x.shape[0],), NUM_LEGS - 1, dtype=jnp.int32)
    # feats[b] = legs[task_ids[b]](x[b])
    feats = jnp.einsum("bd,bdh->bh", x, w_leg[task_ids]) + b_leg[task_ids, 0]
    h = jnp.maximum(feats @ w1 + b1, 0.0)
    return h @ w2 + b2


if __name__ == "__main__":
    key = jax.random.PRNGKey(0)
    k_x, k_p = jax.random.split(key)

    params = init_params(k_p)
    x = jax.random.normal(k_x, (B, D_IN), jnp.float32)
    # mixed tasks across the batch (exercises the per-task leg dispatch)
    task_ids = jnp.array([0, 1, 2, 0, 1, 2, 2, 0], dtype=jnp.int32)

    # two-arg form: forward(input, task_ids)
    out = jax.block_until_ready(mt_leg_model_forward(x, task_ids, params))

    # one-arg form: forward(input) -> all samples routed to the last leg
    out_default = jax.block_until_ready(mt_leg_model_forward(x, None, params))

    ref = ref_forward(x, task_ids, params)
    ref_default = ref_forward(x, None, params)
    assert jnp.allclose(out, ref, atol=1e-4, rtol=1e-4)
    assert jnp.allclose(out_default, ref_default, atol=1e-4, rtol=1e-4)

    print("KERNEL_OK")
</pallas_src>

<mosaic_0001>
module attributes {stable_mosaic.version = 11 : i64} {
  func.func @_mt_leg_kernel(%arg0: memref<8x1xi32, #tpu.memory_space<vmem>>, %arg1: memref<8x32xf32, #tpu.memory_space<vmem>>, %arg2: memref<3x32x128xf32, #tpu.memory_space<vmem>>, %arg3: memref<3x1x128xf32, #tpu.memory_space<vmem>>, %arg4: memref<128x128xf32, #tpu.memory_space<vmem>>, %arg5: memref<1x128xf32, #tpu.memory_space<vmem>>, %arg6: memref<128x128xf32, #tpu.memory_space<vmem>>, %arg7: memref<1x128xf32, #tpu.memory_space<vmem>>, %arg8: memref<8x128xf32, #tpu.memory_space<vmem>>) attributes {dimension_semantics = [], scalar_prefetch = 0 : i64, scratch_operands = 0 : i64, tpu.core_type = #tpu.core_type<tc>} {
    %c0 = arith.constant 0 : index
    %c0_0 = arith.constant 0 : index
    %0 = vector.load %arg1[%c0, %c0_0] : memref<8x32xf32, #tpu.memory_space<vmem>>, vector<8x32xf32>
    %c0_1 = arith.constant 0 : index
    %c0_2 = arith.constant 0 : index
    %1 = vector.load %arg0[%c0_1, %c0_2] : memref<8x1xi32, #tpu.memory_space<vmem>>, vector<8x1xi32>
    %cst = arith.constant 0.000000e+00 : f32
    %2 = vector.broadcast %cst : f32 to vector<8x128xf32>
    %c0_3 = arith.constant 0 : index
    %c0_4 = arith.constant 0 : index
    %c0_5 = arith.constant 0 : index
    %3 = vector.load %arg2[%c0_3, %c0_4, %c0_5] : memref<3x32x128xf32, #tpu.memory_space<vmem>>, vector<1x32x128xf32>
    %4 = vector.shape_cast %3 : vector<1x32x128xf32> to vector<32x128xf32>
    %cst_6 = arith.constant dense<0.000000e+00> : vector<8x128xf32>
    %5 = tpu.matmul %0, %4, %cst_6 {dimension_numbers = #tpu.dot_dimension_numbers<[1], [0], [0], [1], [0, 0, 1, 1], [], []>} : vector<8x32xf32>, vector<32x128xf32>, vector<8x128xf32> -> vector<8x128xf32>
    %c0_7 = arith.constant 0 : index
    %c0_8 = arith.constant 0 : index
    %c0_9 = arith.constant 0 : index
    %6 = vector.load %arg3[%c0_7, %c0_8, %c0_9] : memref<3x1x128xf32, #tpu.memory_space<vmem>>, vector<1x1x128xf32>
    %7 = vector.shape_cast %6 : vector<1x1x128xf32> to vector<1x128xf32>
    %8 = vector.broadcast %7 : vector<1x128xf32> to vector<8x128xf32>
    %9 = arith.addf %5, %8 : vector<8x128xf32>
    %c0_i32 = arith.constant 0 : i32
    %10 = vector.broadcast %c0_i32 : i32 to vector<8x1xi32>
    %11 = arith.cmpi eq, %1, %10 : vector<8x1xi32>
    %12 = vector.shape_cast %11 : vector<8x1xi1> to vector<8x1xi1>
    %13 = vector.broadcast %12 : vector<8x1xi1> to vector<8x128xi1>
    %14 = arith.select %13, %9, %2 : vector<8x128xi1>, vector<8x128xf32>
    %c1 = arith.constant 1 : index
    %c0_10 = arith.constant 0 : index
    %c0_11 = arith.constant 0 : index
    %15 = vector.load %arg2[%c1, %c0_10, %c0_11] : memref<3x32x128xf32, #tpu.memory_space<vmem>>, vector<1x32x128xf32>
    %16 = vector.shape_cast %15 : vector<1x32x128xf32> to vector<32x128xf32>
    %cst_12 = arith.constant dense<0.000000e+00> : vector<8x128xf32>
    %17 = tpu.matmul %0, %16, %cst_12 {dimension_numbers = #tpu.dot_dimension_numbers<[1], [0], [0], [1], [0, 0, 1, 1], [], []>} : vector<8x32xf32>, vector<32x128xf32>, vector<8x128xf32> -> vector<8x128xf32>
    %c1_13 = arith.constant 1 : index
    %c0_14 = arith.constant 0 : index
    %c0_15 = arith.constant 0 : index
    %18 = vector.load %arg3[%c1_13, %c0_14, %c0_15] : memref<3x1x128xf32, #tpu.memory_space<vmem>>, vector<1x1x128xf32>
    %19 = vector.shape_cast %18 : vector<1x1x128xf32> to vector<1x128xf32>
    %20 = vector.broadcast %19 : vector<1x128xf32> to vector<8x128xf32>
    %21 = arith.addf %17, %20 : vector<8x128xf32>
    %c1_i32 = arith.constant 1 : i32
    %22 = vector.broadcast %c1_i32 : i32 to vector<8x1xi32>
    %23 = arith.cmpi eq, %1, %22 : vector<8x1xi32>
    %24 = vector.shape_cast %23 : vector<8x1xi1> to vector<8x1xi1>
    %25 = vector.broadcast %24 : vector<8x1xi1> to vector<8x128xi1>
    %26 = arith.select %25, %21, %14 : vector<8x128xi1>, vector<8x128xf32>
    %c2 = arith.constant 2 : index
    %c0_16 = arith.constant 0 : index
    %c0_17 = arith.constant 0 : index
    %27 = vector.load %arg2[%c2, %c0_16, %c0_17] : memref<3x32x128xf32, #tpu.memory_space<vmem>>, vector<1x32x128xf32>
    %28 = vector.shape_cast %27 : vector<1x32x128xf32> to vector<32x128xf32>
    %cst_18 = arith.constant dense<0.000000e+00> : vector<8x128xf32>
    %29 = tpu.matmul %0, %28, %cst_18 {dimension_numbers = #tpu.dot_dimension_numbers<[1], [0], [0], [1], [0, 0, 1, 1], [], []>} : vector<8x32xf32>, vector<32x128xf32>, vector<8x128xf32> -> vector<8x128xf32>
    %c2_19 = arith.constant 2 : index
    %c0_20 = arith.constant 0 : index
    %c0_21 = arith.constant 0 : index
    %30 = vector.load %arg3[%c2_19, %c0_20, %c0_21] : memref<3x1x128xf32, #tpu.memory_space<vmem>>, vector<1x1x128xf32>
    %31 = vector.shape_cast %30 : vector<1x1x128xf32> to vector<1x128xf32>
    %32 = vector.broadcast %31 : vector<1x128xf32> to vector<8x128xf32>
    %33 = arith.addf %29, %32 : vector<8x128xf32>
    %c2_i32 = arith.constant 2 : i32
    %34 = vector.broadcast %c2_i32 : i32 to vector<8x1xi32>
    %35 = arith.cmpi eq, %1, %34 : vector<8x1xi32>
    %36 = vector.shape_cast %35 : vector<8x1xi1> to vector<8x1xi1>
    %37 = vector.broadcast %36 : vector<8x1xi1> to vector<8x128xi1>
    %38 = arith.select %37, %33, %26 : vector<8x128xi1>, vector<8x128xf32>
    %c0_22 = arith.constant 0 : index
    %c0_23 = arith.constant 0 : index
    %39 = vector.load %arg4[%c0_22, %c0_23] : memref<128x128xf32, #tpu.memory_space<vmem>>, vector<128x128xf32>
    %cst_24 = arith.constant dense<0.000000e+00> : vector<8x128xf32>
    %40 = tpu.matmul %38, %39, %cst_24 {dimension_numbers = #tpu.dot_dimension_numbers<[1], [0], [0], [1], [0, 0, 1, 1], [], []>} : vector<8x128xf32>, vector<128x128xf32>, vector<8x128xf32> -> vector<8x128xf32>
    %c0_25 = arith.constant 0 : index
    %c0_26 = arith.constant 0 : index
    %41 = vector.load %arg5[%c0_25, %c0_26] : memref<1x128xf32, #tpu.memory_space<vmem>>, vector<1x128xf32>
    %42 = vector.broadcast %41 : vector<1x128xf32> to vector<8x128xf32>
    %43 = arith.addf %40, %42 : vector<8x128xf32>
    %cst_27 = arith.constant 0.000000e+00 : f32
    %44 = vector.broadcast %cst_27 : f32 to vector<8x128xf32>
    %45 = arith.maximumf %43, %44 : vector<8x128xf32>
    %c0_28 = arith.constant 0 : index
    %c0_29 = arith.constant 0 : index
    %46 = vector.load %arg6[%c0_28, %c0_29] : memref<128x128xf32, #tpu.memory_space<vmem>>, vector<128x128xf32>
    %cst_30 = arith.constant dense<0.000000e+00> : vector<8x128xf32>
    %47 = tpu.matmul %45, %46, %cst_30 {dimension_numbers = #tpu.dot_dimension_numbers<[1], [0], [0], [1], [0, 0, 1, 1], [], []>} : vector<8x128xf32>, vector<128x128xf32>, vector<8x128xf32> -> vector<8x128xf32>
    %c0_31 = arith.constant 0 : index
    %c0_32 = arith.constant 0 : index
    %48 = vector.load %arg7[%c0_31, %c0_32] : memref<1x128xf32, #tpu.memory_space<vmem>>, vector<1x128xf32>
    %49 = vector.broadcast %48 : vector<1x128xf32> to vector<8x128xf32>
    %50 = arith.addf %47, %49 : vector<8x128xf32>
    %c0_33 = arith.constant 0 : index
    %c0_34 = arith.constant 0 : index
    %51 = vector.load %arg8[%c0_33, %c0_34] : memref<8x128xf32, #tpu.memory_space<vmem>>, vector<8x128xf32>
    tpu.vector_store %arg8[%c0_33, %c0_34], %50 {strides = array<i32>} : memref<8x128xf32, #tpu.memory_space<vmem>>, vector<8x128xf32>,
    return
  }
}

</mosaic_0001>

<bundles_post_ra>
// kernel: mt_leg_model_forward.1
= control target key start
LH: loop header
LB: loop body
LE: loop exit
PB: predicated region body
PF: predicated region fallthrough
CT: control target
= control target key end

     0   :  { %v704_v2 = vmov 0.0   ;;  %vm705_vm0 = vmmov 0   ;;  %vm43_vm1 = vcmask 261120   ;;  %s966_s0 = inlined_call_operand.vmem [shape: s32[8,1], index: 0, kind: input, shape index: {}]   ;;  %s967_s1 = inlined_call_operand.vmem [shape: f32[8,32], index: 1, kind: input, shape index: {}]   ;;  %s968_s2 = inlined_call_operand.vmem [shape: f32[3,32,128], index: 2, kind: input, shape index: {}]   ;;  %s969_s3 = inlined_call_operand.vmem [shape: f32[3,1,128], index: 3, kind: input, shape index: {}]   ;;  %s970_s4 = inlined_call_operand.vmem [shape: f32[128,128], index: 4, kind: input, shape index: {}]   ;;  %s971_s5 = inlined_call_operand.vmem [shape: f32[1,128], index: 5, kind: input, shape index: {}]   ;;  %s972_s6 = inlined_call_operand.vmem [shape: f32[128,128], index: 6, kind: input, shape index: {}]   ;;  %s973_s7 = inlined_call_operand.vmem [shape: f32[1,128], index: 7, kind: input, shape index: {}]   ;;  %s974_s8 = inlined_call_operand.hbm [shape: f32[8,128], index: 8, kind: output, shape index: {}]  }
   0x1   :  { %v35_v0 = vld [vmem:[%s968_s2 + $0x18] sm:$0xff]  ;;  %573 = vmatprep.subr.mxu0 %v704_v2  ;;  %584 = vmatprep.subr.mxu1 %v704_v2  ;;  %v34_v3 = vld [vmem:[%s968_s2 + $0x10] sm:$0xff]  ;;  %v33_v5 = vld [vmem:[%s968_s2 + $0x8] sm:$0xff] }
   0x2   :  { %v511_v1 = vld [vmem:[%s968_s2 + $0x38] sm:$0xff]  ;;  %v510_v4 = vld [vmem:[%s968_s2 + $0x30] sm:$0xff]  ;;  %574 = vmatpush3.msra.mxu0 %v35_v0  ;;  %v509_v6 = vld [vmem:[%s968_s2 + $0x28] sm:$0xff]  ;;  %581 = vmatprep.mubr.msk.f32.mxu0 %vm705_vm0, %v704_v2 }
   0x3   :  { %585 = vmatpush3.msra.mxu1 %v511_v1  ;;  %575 = vmatprep.subr.mxu0 %v704_v2  ;;  %v32_v7 = vld [vmem:[%s968_s2] sm:$0xff] }
   0x4   :  { %586 = vmatprep.subr.mxu1 %v704_v2  ;;  %576 = vmatpush3.msra.mxu0 %v34_v3  ;;  %v31_v8 = vld [vmem:[%s966_s0] sm:$0xff] }
   0x5   :  { %587 = vmatpush3.msra.mxu1 %v510_v4  ;;  %577 = vmatprep.subr.mxu0 %v704_v2  ;;  %v30_v9 = vld [vmem:[%s967_s1] sm:$0xff] }
   0x6   :  { %588 = vmatprep.subr.mxu1 %v704_v2  ;;  %578 = vmatpush3.msra.mxu0 %v33_v5  ;;  %v508_v10 = vld [vmem:[%s968_s2 + $0x20] sm:$0xff] }
   0x7   :  { %579 = vmatprep.subr.mxu0 %v704_v2  ;;  %589 = vmatpush3.msra.mxu1 %v509_v6 }
   0x8   :  { %13 = vsyncpa [#allocation3], 0  ;;  %580 = vmatpush3.msra.mxu0 %v32_v7  ;;  %590 = vmatprep.subr.mxu1 %v704_v2  ;;  %v518_v11 = vld [vmem:[%s968_s2 + $0x58] sm:$0xff]  ;;  %vm117_vm2 = vcmp.eq.s32.totalorder %v31_v8, 0  ;;  %v517_v12 = vld [vmem:[%s968_s2 + $0x50] sm:$0xff]  ;;  %vm297_vm3 = vcmp.eq.s32.totalorder %v31_v8, 2 }
   0x9   :  { %582 = vmatmul.mubr.msk.f32.vlgmr.msra.gmra.mxu0 %vm43_vm1, %v30_v9  ;;  %595 = vmatprep.subr.mxu0 %v704_v2  ;;  %v706_v13 = vmov 0   ;;  %v516_v15 = vld [vmem:[%s968_s2 + $0x48] sm:$0xff]  ;;  %vm207_vm4 = vcmp.eq.s32.totalorder %v31_v8, 1  ;;  %v515_v17 = vld [vmem:[%s968_s2 + $0x40] sm:$0xff]  ;;  %v319_v19 = vld [vmem:[%s970_s4 + $0x78] sm:$0xff]  ;;  %s707_s27 = smov [#allocation2]  }
   0xa   :  { %591 = vmatpush3.msra.mxu1 %v508_v10  ;;  %592 = vmatprep.mubr.msk.f32.mxu1 %vm705_vm0, %v704_v2  ;;  %v118_v14 = vsel %vm117_vm2, 1, %v706_v13  ;;  %v298_v16 = vsel %vm297_vm3, 1, %v706_v13  ;;  %v208_v18 = vsel %vm207_vm4, 1, %v706_v13  ;;  %v318_v20 = vld [vmem:[%s970_s4 + $0x70] sm:$0xff]  ;;  %v317_v21 = vld [vmem:[%s970_s4 + $0x68] sm:$0xff]  ;;  %v316_v22 = vld [vmem:[%s970_s4 + $0x60] sm:$0xff] }
   0xb   :  { %596 = vmatpush3.msra.mxu0 %v518_v11  ;;  %593 = vmatmul.mubr.msk.f32.vlgmr.msra.gmra.mxu1 %vm43_vm1, %v30_v9  ;;  %v315_v23 = vld [vmem:[%s970_s4 + $0x58] sm:$0xff]  ;;  %v314_v24 = vld [vmem:[%s970_s4 + $0x50] sm:$0xff]  ;;  %v313_v25 = vld [vmem:[%s970_s4 + $0x48] sm:$0xff]  ;;  %s498_s28 = sshll.u32 %s707_s27, 4  ;;  %s499_s28 = int_to_ptr.vmem [resolvable:$true] %s498_s28 }
   0xc   :  { %597 = vmatprep.subr.mxu0 %v704_v2  ;;  %603 = vmatprep.mubr.msk.f32.mxu0 %vm705_vm0, %v704_v2  ;;  %v312_v26 = vld [vmem:[%s970_s4 + $0x40] sm:$0xff]  ;;  %v311_v27 = vld [vmem:[%s970_s4 + $0x38] sm:$0xff]  ;;  %v310_v28 = vld [vmem:[%s970_s4 + $0x30] sm:$0xff]  ;;  %p687_p1 = scmp.lt.s32.totalorder %s499_s28, %s499_s28 }
   0xd   :  { %598 = vmatpush3.msra.mxu0 %v517_v12  ;;  %680 = vset.pattern.permute.xlu0 %v706_v13  ;;  %v309_v29 = vld [vmem:[%s970_s4 + $0x28] sm:$0xff]  ;;  %v308_v30 = vld [vmem:[%s970_s4 + $0x20] sm:$0xff]  ;;  %v307_v31 = vld [vmem:[%s970_s4 + $0x18] sm:$0xff] }
   0xe   :  { %599 = vmatprep.subr.mxu0 %v704_v2  ;;  %120 = vperm.xlu0 %680, %v118_v14   ;;  %v306_v32 = vld [vmem:[%s970_s4 + $0x10] sm:$0xff]  ;;  %v305_v33 = vld [vmem:[%s970_s4 + $0x8] sm:$0xff]  ;;  %v304_v34 = vld [vmem:[%s970_s4] sm:$0xff] }
   0xf   :  { %600 = vmatpush3.msra.mxu0 %v516_v15  ;;  %681 = vset.pattern.permute.xlu1 %v706_v13  ;;  %v413_v35 = vld [vmem:[%s972_s6 + $0x78] sm:$0xff]  ;;  %v412_v36 = vld [vmem:[%s972_s6 + $0x70] sm:$0xff]  ;;  %v411_v37 = vld [vmem:[%s972_s6 + $0x68] sm:$0xff] }
  0x10   :  { %601 = vmatprep.subr.mxu0 %v704_v2  ;;  %300 = vperm.xlu1 %681, %v298_v16   ;;  %v410_v38 = vld [vmem:[%s972_s6 + $0x60] sm:$0xff]  ;;  %v409_v39 = vld [vmem:[%s972_s6 + $0x58] sm:$0xff]  ;;  %v408_v40 = vld [vmem:[%s972_s6 + $0x50] sm:$0xff] }
  0x11   :  { %602 = vmatpush3.msra.mxu0 %v515_v17  ;;  %606 = vmatprep.subr.mxu1 %v704_v2  ;;  %v407_v41 = vld [vmem:[%s972_s6 + $0x48] sm:$0xff]  ;;  %v406_v42 = vld [vmem:[%s972_s6 + $0x40] sm:$0xff]  ;;  %v405_v43 = vld [vmem:[%s972_s6 + $0x38] sm:$0xff] }
  0x12   :  { %604 = vmatmul.mubr.msk.f32.vlgmr.msra.gmra.mxu0 %vm43_vm1, %v30_v9  ;;  %210 = vperm.xlu0 %680, %v208_v18   ;;  %v404_v44 = vld [vmem:[%s972_s6 + $0x30] sm:$0xff]  ;;  %v403_v45 = vld [vmem:[%s972_s6 + $0x28] sm:$0xff]  ;;  %v402_v46 = vld [vmem:[%s972_s6 + $0x20] sm:$0xff] }
  0x13   :  { %607 = vmatpush3.msra.mxu1 %v319_v19  ;;  %638 = vmatprep.mubr.msk.f32.mxu1 %vm705_vm0, %v704_v2  ;;  %v401_v47 = vld [vmem:[%s972_s6 + $0x18] sm:$0xff]  ;;  %v506_v50 = vld [vmem:[%s969_s3] ss:$0 sm:$0xff]  ;;  %v513_v54 = vld [vmem:[%s969_s3 + $0x1] ss:$0 sm:$0xff] }
  0x14   :  { %608 = vmatprep.subr.mxu1 %v704_v2  ;;  %641 = vmatprep.subr.mxu0 %v704_v2  ;;  %v520_v59 = vld [vmem:[%s969_s3 + $0x2] ss:$0 sm:$0xff]  ;;  %v400_v3 = vld [vmem:[%s972_s6 + $0x10] sm:$0xff]  ;;  %v399_v4 = vld [vmem:[%s972_s6 + $0x8] sm:$0xff] }
  0x15   :  { %609 = vmatpush3.msra.mxu1 %v318_v20  ;;  %673 = vmatprep.mubr.msk.f32.mxu0 %vm705_vm0, %v704_v2  ;;  %v398_v5 = vld [vmem:[%s972_s6] sm:$0xff]  ;;  %s682_s6 = scalar_lea.vmem %s499_s28, 128 }
  0x16   :  { %610 = vmatprep.subr.mxu1 %v704_v2  ;;  %642 = vmatpush3.msra.mxu0 %v413_v35  ;;  %v522_v6 = vld [vmem:[%s971_s5] ss:$0 sm:$0xff]  ;;  %p683_p0 = scmp.ne.s32.totalorder %s499_s28, %s682_s6  ;;  %p688_p2 = scmp.lt.s32.totalorder %s682_s6, %s682_s6 }
  0x17   :  { %611 = vmatpush3.msra.mxu1 %v317_v21  ;;  %643 = vmatprep.subr.mxu0 %v704_v2  ;;  %v523_v11 = vld [vmem:[%s973_s7] ss:$0 sm:$0xff] }
  0x18   :  { %612 = vmatprep.subr.mxu1 %v704_v2  ;;  %644 = vmatpush3.msra.mxu0 %v412_v36  ;;  %p689_p3 = por %p688_p2, %p687_p1 }
  0x19   :  { %613 = vmatpush3.msra.mxu1 %v316_v22  ;;  %645 = vmatprep.subr.mxu0 %v704_v2 }
  0x1a   :  { %614 = vmatprep.subr.mxu1 %v704_v2  ;;  %646 = vmatpush3.msra.mxu0 %v411_v37  ;;  %p690_p4 = pnand %p689_p3, %p683_p0 }
  0x1b   :  { %615 = vmatpush3.msra.mxu1 %v315_v23  ;;  %647 = vmatprep.subr.mxu0 %v704_v2 }
  0x1c   :  { %616 = vmatprep.subr.mxu1 %v704_v2  ;;  %648 = vmatpush3.msra.mxu0 %v410_v38 }
  0x1d   :  { %617 = vmatpush3.msra.mxu1 %v314_v24  ;;  %649 = vmatprep.subr.mxu0 %v704_v2 }
  0x1e   :  { %618 = vmatprep.subr.mxu1 %v704_v2  ;;  %650 = vmatpush3.msra.mxu0 %v409_v39 }
  0x1f   :  { %619 = vmatpush3.msra.mxu1 %v313_v25  ;;  %651 = vmatprep.subr.mxu0 %v704_v2 }
  0x20   :  { %620 = vmatprep.subr.mxu1 %v704_v2  ;;  %652 = vmatpush3.msra.mxu0 %v408_v40 }
  0x21   :  { %621 = vmatpush3.msra.mxu1 %v312_v26  ;;  %653 = vmatprep.subr.mxu0 %v704_v2 }
  0x22   :  { %622 = vmatprep.subr.mxu1 %v704_v2  ;;  %654 = vmatpush3.msra.mxu0 %v407_v41 }
  0x23   :  { %623 = vmatpush3.msra.mxu1 %v311_v27  ;;  %655 = vmatprep.subr.mxu0 %v704_v2 }
  0x24   :  { %624 = vmatprep.subr.mxu1 %v704_v2  ;;  %656 = vmatpush3.msra.mxu0 %v406_v42 }
  0x25   :  { %625 = vmatpush3.msra.mxu1 %v310_v28  ;;  %657 = vmatprep.subr.mxu0 %v704_v2 }
  0x26   :  { %626 = vmatprep.subr.mxu1 %v704_v2  ;;  %658 = vmatpush3.msra.mxu0 %v405_v43 }
  0x27   :  { %627 = vmatpush3.msra.mxu1 %v309_v29  ;;  %659 = vmatprep.subr.mxu0 %v704_v2 }
  0x28   :  { %628 = vmatprep.subr.mxu1 %v704_v2  ;;  %660 = vmatpush3.msra.mxu0 %v404_v44 }
  0x29   :  { %629 = vmatpush3.msra.mxu1 %v308_v30  ;;  %661 = vmatprep.subr.mxu0 %v704_v2 }
  0x2a   :  { %630 = vmatprep.subr.mxu1 %v704_v2  ;;  %662 = vmatpush3.msra.mxu0 %v403_v45 }
  0x2b   :  { %631 = vmatpush3.msra.mxu1 %v307_v31  ;;  %663 = vmatprep.subr.mxu0 %v704_v2 }
  0x2c   :  { %632 = vmatprep.subr.mxu1 %v704_v2  ;;  %664 = vmatpush3.msra.mxu0 %v402_v46 }
  0x2d   :  { %633 = vmatpush3.msra.mxu1 %v306_v32  ;;  %665 = vmatprep.subr.mxu0 %v704_v2 }
  0x2e   :  { %634 = vmatprep.subr.mxu1 %v704_v2  ;;  %666 = vmatpush3.msra.mxu0 %v401_v47 }
  0x2f   :  { %635 = vmatpush3.msra.mxu1 %v305_v33  ;;  %667 = vmatprep.subr.mxu0 %v704_v2 }
  0x30   :  { %636 = vmatprep.subr.mxu1 %v704_v2  ;;  %668 = vmatpush3.msra.mxu0 %v400_v3 }
  0x31   :  { %637 = vmatpush3.msra.mxu1 %v304_v34  ;;  %669 = vmatprep.subr.mxu0 %v704_v2 }
  0x32   :  { %670 = vmatpush3.msra.mxu0 %v399_v4 }
  0x33   :  { %671 = vmatprep.subr.mxu0 %v704_v2 }
  0x34   :  { %672 = vmatpush3.msra.mxu0 %v398_v5 }
  0x89   :  { %v121_v48 = vpop.permute.xlu0 %120 }
  0x8a   :  { %vm122_vm5 = vcmp.eq.s32.totalorder %v121_v48, 1 }
  0x8b   :  { %v301_v57 = vpop.permute.xlu1 %300 }
  0x8c   :  { %vm302_vm7 = vcmp.eq.s32.totalorder %v301_v57, 1 }
  0x8d   :  { %v211_v56 = vpop.permute.xlu0 %210 }
  0x8e   :  { %vm212_vm6 = vcmp.eq.s32.totalorder %v211_v56, 1 }
  0xc9   :  { %v113_v49 = vpop.f32.mrf.mxu0 }
  0xca   :  { %v114_v53 = vadd.f32 %v506_v50, %v113_v49 }
  0xcb   :  { %v583_v51 = vpop.f32.mrf.mxu0  ;;  %v203_v52 = vpop.f32.mrf.mxu1 }
  0xcc   :  { %v204_v58 = vadd.f32 %v513_v54, %v203_v52  ;;  %v123_v60 = vsel %vm122_vm5, %v114_v53, 0.0 }
  0xcd   :  { %v594_v55 = vpop.f32.mrf.mxu1 }
  0xce   :  { %v213_v63 = vsel %vm212_vm6, %v204_v58, %v123_v60 }
  0xd2   :  { %v293_v61 = vpop.f32.mrf.mxu0 }
  0xd3   :  { %v294_v62 = vadd.f32 %v520_v59, %v293_v61 }
  0xd4   :  { %v605_v0 = vpop.f32.mrf.mxu0 }
  0xd5   :  { %v303_v1 = vsel %vm302_vm7, %v294_v62, %v213_v63 }
  0xd6   :  { %639 = vmatmul.mubr.f32.vlgmr.msra.gmra.mxu1 %v303_v1 }
 0x196   :  { %v393_v7 = vpop.f32.mrf.mxu1 }
 0x197   :  { %v394_v8 = vadd.f32 %v522_v6, %v393_v7 }
 0x198   :  { %v640_v9 = vpop.f32.mrf.mxu1 }
 0x199   :  { %v397_v10 = vmax.f32 %v394_v8, 0.0 }
 0x19b   :  { %674 = vmatmul.mubr.f32.vlgmr.msra.gmra.mxu0 %v397_v10 }
 0x25b   :  { %v487_v2 = vpop.f32.mrf.mxu0 }
 0x25c   :  { %v488_v12 = vadd.f32 %v523_v11, %v487_v2 }
 0x25d   :  { %v675_v13 = vpop.f32.mrf.mxu0 }
 0x25e   :  { %491 = vst [vmem:[#allocation2] sm:$0xff] %v488_v12 }
 0x25f   :  { %693 = shalt.err (!%p690_p4)
}
 0x260   :  { %501 = dma.vmem_to_hbm [thread:$0]  %s499_s28, 128, %s974_s8, [#allocation3]  }
 0x261   :  { %702 = dma.done.wait [#allocation3], 128  }
 0x262   :  { %703 = vsyncadd [#allocation3], 4294967168 }
 0x263   :  { %505 = vsyncpa [#allocation3], 1 }

</bundles_post_ra>
